<compile_context>
chip_gen: v7x
topology: tpu7x:2x2x1
jax: 0.10.0
libtpu: 0.0.40
codegen_flags: <defaults>
</compile_context>

<pallas_src>
import functools

import jax
import jax.numpy as jnp
import numpy as np
from jax.experimental import pallas as pl
from jax.experimental.pallas import tpu as pltpu


def gcn_kernel(x_ref, w1_ref, w2_ref, o_ref, *, ks, row_stride, out_len, pad_h, pad_w):
    """Fused GCN block on one group of G images laid out as (G*C, Lp).

    x_ref : (GC, Lp)            zero-padded flat rows; lane index = h*W + w (per image)
    w1_ref: (2, GC, ks*GC)      im2col'd block-diag taps for [left stage1, right stage1]
    w2_ref: (2, GC, (ks+1)*GC)  same for [left stage2, right stage2]; the trailing GC
                                columns carry the folded per-branch bias (they multiply
                                the all-ones block appended to the im2col stack)
    o_ref : (GC, out_len)       flat output; only columns with h < Ho, w < Wo are valid
    """
    x = x_ref[...]
    gc = x.shape[0]

    def im2col(v, unit, length, append_ones):
        # Stack the ks shifted views along the contraction axis so each conv stage is a
        # single MXU dot (K = ks*GC [+ GC]) instead of a ks-deep serial dot+add chain.
        parts = [v[:, k * unit:k * unit + length] for k in range(ks)]
        if append_ones:
            parts.append(jnp.ones((gc, length), dtype=v.dtype))
        return jnp.concatenate(parts, axis=0)

    # First stages read x:  left = (ks,1) conv over H (flat stride W),
    #                       right = (1,ks) conv over W (flat stride 1).
    mid_l = jnp.dot(w1_ref[0], im2col(x, row_stride, out_len + pad_w, False),
                    preferred_element_type=jnp.float32)
    mid_r = jnp.dot(w1_ref[1], im2col(x, 1, out_len + pad_h, False),
                    preferred_element_type=jnp.float32)

    # Second stages; the folded bias rides the MXU via the trailing ones block.
    out_l = jnp.dot(w2_ref[0], im2col(mid_l, 1, out_len, True),
                    preferred_element_type=jnp.float32)
    out_r = jnp.dot(w2_ref[1], im2col(mid_r, row_stride, out_len, True),
                    preferred_element_type=jnp.float32)

    # f32 epilogue, one lane-dense store of the whole block.
    o_ref[...] = jnp.maximum(out_l + out_r, 0.0).astype(o_ref.dtype)


def gcn_forward(x, wl1, bl1, wl2, bl2, wr1, br1, wr2, br2):
    """x: (N, C, H, W); Conv2d weights in PyTorch OIHW layout; biases (C,)."""
    N, C, H, W = x.shape
    ks = wl1.shape[2]
    Ho, Wo = H - ks + 1, W - ks + 1
    out_len = H * W
    pad_h, pad_w = (ks - 1) * W, ks - 1

    # Lane-padded per-image row length. Static guard: every in-kernel read
    # (max offset pad_h/pad_w + stage length) must stay inside the padded slab.
    limg = ((out_len + pad_h + pad_w + 127) // 128) * 128
    assert out_len + pad_h + pad_w <= limg, "kernel would read past the padded slab"

    # Images per grid step: fill the 8 f32 sublanes (block rows = G*C).
    G = max(1, 8 // C)
    if N % G != 0:
        G = 1
    if (G * C) % 8 != 0 and N // G > 1:
        G = N  # single block == full array dims, so no (8,128) block constraint
    GC = G * C

    f32 = jnp.float32
    eye_g = jnp.eye(G, dtype=f32)

    def taps_h(w):  # (O, I, ks, 1) -> (ks, O, I): taps along H
        return jnp.transpose(w[:, :, :, 0], (2, 0, 1)).astype(f32)

    def taps_w(w):  # (O, I, 1, ks) -> (ks, O, I): taps along W
        return jnp.transpose(w[:, :, 0, :], (2, 0, 1)).astype(f32)

    def im2col_weight(taps, bias=None):
        # Block-diagonal over the G images in a block, taps stacked along the K axis.
        blocks = [jnp.kron(eye_g, taps[k]) for k in range(ks)]          # ks x (GC, GC)
        if bias is not None:
            # Extra (GC, GC) block that multiplies the all-ones rows appended in-kernel:
            # first column carries the folded bias, the rest are zero.
            bias_block = jnp.concatenate(
                [jnp.tile(bias, G)[:, None], jnp.zeros((GC, GC - 1), f32)], axis=1)
            blocks.append(bias_block)
        return jnp.concatenate(blocks, axis=1)                          # (GC, K)

    tl1, tl2 = taps_h(wl1), taps_w(wl2)
    tr1, tr2 = taps_w(wr1), taps_h(wr2)

    # Fold each branch's first-stage bias through its second-stage taps (exact):
    #   b_branch = b2 + (sum_k w2_k) @ b1
    bias_l = bl2.astype(f32) + tl2.sum(0) @ bl1.astype(f32)
    bias_r = br2.astype(f32) + tr2.sum(0) @ br1.astype(f32)

    w1 = jnp.stack([im2col_weight(tl1), im2col_weight(tr1)])                  # (2, GC, ks*GC)
    w2 = jnp.stack([im2col_weight(tl2, bias_l), im2col_weight(tr2, bias_r)])  # (2, GC, (ks+1)*GC)

    # Pure reshape (no transpose) + lane pad: the pad is the only pre-kernel copy.
    x_rows = x.reshape(N * C, out_len).astype(f32)
    x_pad = jnp.pad(x_rows, ((0, 0), (0, limg - out_len)))

    kernel = functools.partial(gcn_kernel, ks=ks, row_stride=W,
                               out_len=out_len, pad_h=pad_h, pad_w=pad_w)

    out_rows = pl.pallas_call(
        kernel,
        out_shape=jax.ShapeDtypeStruct((N * C, out_len), f32),
        grid_spec=pltpu.PrefetchScalarGridSpec(
            num_scalar_prefetch=0,
            grid=(N // G,),
            in_specs=[
                pl.BlockSpec((GC, limg), lambda i: (i, 0)),
                pl.BlockSpec(w1.shape, lambda i: (0, 0, 0)),   # resident weights
                pl.BlockSpec(w2.shape, lambda i: (0, 0, 0)),
            ],
            out_specs=pl.BlockSpec((GC, out_len), lambda i: (i, 0)),
        ),
        compiler_params=pltpu.CompilerParams(
            dimension_semantics=("parallel",)),
    )(x_pad, w1, w2)

    # Free reshape + one small slice: keep only the VALID conv region.
    out = out_rows.reshape(N, C, H, W)[:, :, :Ho, :Wo]
    return out.astype(x.dtype)


def gcn_reference(x, wl1, bl1, wl2, bl2, wr1, br1, wr2, br2):
    """Pure-JAX reference matching torch.nn.Conv2d (VALID, stride 1, NCHW)."""
    def conv(x, w, b):
        y = jax.lax.conv_general_dilated(
            x, w, window_strides=(1, 1), padding="VALID",
            dimension_numbers=("NCHW", "OIHW", "NCHW"))
        return y + b.reshape(1, -1, 1, 1)
    x_l = conv(conv(x, wl1, bl1), wl2, bl2)
    x_r = conv(conv(x, wr1, br1), wr2, br2)
    return jnp.maximum(x_l + x_r, 0.0)


if __name__ == "__main__":
    N, C, H, W, KS = 2, 4, 16, 16, 7

    key = jax.random.PRNGKey(0)
    kx, *pk = jax.random.split(key, 10)
    x = jax.random.normal(kx, (N, C, H, W), jnp.float32)

    # Deterministic Conv2d-style init (uniform in +/- 1/sqrt(fan_in)).
    fan_in = C * KS
    bound = 1.0 / (fan_in ** 0.5)

    def u(k, shape):
        return jax.random.uniform(k, shape, jnp.float32, -bound, bound)

    wl1 = u(pk[0], (C, C, KS, 1)); bl1 = u(pk[1], (C,))
    wl2 = u(pk[2], (C, C, 1, KS)); bl2 = u(pk[3], (C,))
    wr1 = u(pk[4], (C, C, 1, KS)); br1 = u(pk[5], (C,))
    wr2 = u(pk[6], (C, C, KS, 1)); br2 = u(pk[7], (C,))

    out = jax.jit(gcn_forward)(x, wl1, bl1, wl2, bl2, wr1, br1, wr2, br2)
    out = jax.block_until_ready(out)

    ref = gcn_reference(x, wl1, bl1, wl2, bl2, wr1, br1, wr2, br2)
    assert out.shape == (N, C, H - KS + 1, W - KS + 1)
    np.testing.assert_allclose(np.asarray(out), np.asarray(ref),
                               atol=5e-4, rtol=5e-4)
    print("KERNEL_OK")
</pallas_src>

<mosaic_0001>
module attributes {stable_mosaic.version = 11 : i64} {
  func.func @gcn_kernel(%arg0: i32, %arg1: memref<8x384xf32, #tpu.memory_space<vmem>>, %arg2: memref<2x8x56xf32, #tpu.memory_space<vmem>>, %arg3: memref<2x8x64xf32, #tpu.memory_space<vmem>>, %arg4: memref<8x256xf32, #tpu.memory_space<vmem>>) attributes {dimension_semantics = [#tpu.dimension_semantics<parallel>], iteration_bounds = array<i64: 1>, scalar_prefetch = 0 : i64, scratch_operands = 0 : i64, tpu.core_type = #tpu.core_type<tc>, window_params = [{transform_indices = @transform_0, window_bounds = array<i64: 8, 384>}, {pipeline_mode = #tpu.pipeline_mode<synchronous>, transform_indices = @transform_1, window_bounds = array<i64: 2, 8, 56>}, {pipeline_mode = #tpu.pipeline_mode<synchronous>, transform_indices = @transform_2, window_bounds = array<i64: 2, 8, 64>}, {transform_indices = @transform_3, window_bounds = array<i64: 8, 256>}]} {
    %c0 = arith.constant 0 : index
    %c0_0 = arith.constant 0 : index
    %0 = vector.load %arg1[%c0, %c0_0] : memref<8x384xf32, #tpu.memory_space<vmem>>, vector<8x384xf32>
    %c0_1 = arith.constant 0 : index
    %c0_2 = arith.constant 0 : index
    %c0_3 = arith.constant 0 : index
    %1 = vector.load %arg2[%c0_1, %c0_2, %c0_3] : memref<2x8x56xf32, #tpu.memory_space<vmem>>, vector<1x8x56xf32>
    %2 = vector.shape_cast %1 : vector<1x8x56xf32> to vector<8x56xf32>
    %3 = vector.extract_strided_slice %0 {offsets = [0, 0], sizes = [8, 262], strides = [1, 1]} : vector<8x384xf32> to vector<8x262xf32>
    %4 = vector.extract_strided_slice %0 {offsets = [0, 16], sizes = [8, 262], strides = [1, 1]} : vector<8x384xf32> to vector<8x262xf32>
    %5 = vector.extract_strided_slice %0 {offsets = [0, 32], sizes = [8, 262], strides = [1, 1]} : vector<8x384xf32> to vector<8x262xf32>
    %6 = vector.extract_strided_slice %0 {offsets = [0, 48], sizes = [8, 262], strides = [1, 1]} : vector<8x384xf32> to vector<8x262xf32>
    %7 = vector.extract_strided_slice %0 {offsets = [0, 64], sizes = [8, 262], strides = [1, 1]} : vector<8x384xf32> to vector<8x262xf32>
    %8 = vector.extract_strided_slice %0 {offsets = [0, 80], sizes = [8, 262], strides = [1, 1]} : vector<8x384xf32> to vector<8x262xf32>
    %9 = vector.extract_strided_slice %0 {offsets = [0, 96], sizes = [8, 262], strides = [1, 1]} : vector<8x384xf32> to vector<8x262xf32>
    %10 = tpu.concatenate %3, %4, %5, %6, %7, %8, %9 in 0 : vector<8x262xf32>, vector<8x262xf32>, vector<8x262xf32>, vector<8x262xf32>, vector<8x262xf32>, vector<8x262xf32>, vector<8x262xf32> -> vector<56x262xf32>
    %cst = arith.constant dense<0.000000e+00> : vector<8x262xf32>
    %11 = tpu.matmul %2, %10, %cst {dimension_numbers = #tpu.dot_dimension_numbers<[1], [0], [0], [1], [0, 0, 1, 1], [], []>} : vector<8x56xf32>, vector<56x262xf32>, vector<8x262xf32> -> vector<8x262xf32>
    %c1 = arith.constant 1 : index
    %c0_4 = arith.constant 0 : index
    %c0_5 = arith.constant 0 : index
    %12 = vector.load %arg2[%c1, %c0_4, %c0_5] : memref<2x8x56xf32, #tpu.memory_space<vmem>>, vector<1x8x56xf32>
    %13 = vector.shape_cast %12 : vector<1x8x56xf32> to vector<8x56xf32>
    %14 = vector.extract_strided_slice %0 {offsets = [0, 0], sizes = [8, 352], strides = [1, 1]} : vector<8x384xf32> to vector<8x352xf32>
    %15 = vector.extract_strided_slice %0 {offsets = [0, 1], sizes = [8, 352], strides = [1, 1]} : vector<8x384xf32> to vector<8x352xf32>
    %16 = vector.extract_strided_slice %0 {offsets = [0, 2], sizes = [8, 352], strides = [1, 1]} : vector<8x384xf32> to vector<8x352xf32>
    %17 = vector.extract_strided_slice %0 {offsets = [0, 3], sizes = [8, 352], strides = [1, 1]} : vector<8x384xf32> to vector<8x352xf32>
    %18 = vector.extract_strided_slice %0 {offsets = [0, 4], sizes = [8, 352], strides = [1, 1]} : vector<8x384xf32> to vector<8x352xf32>
    %19 = vector.extract_strided_slice %0 {offsets = [0, 5], sizes = [8, 352], strides = [1, 1]} : vector<8x384xf32> to vector<8x352xf32>
    %20 = vector.extract_strided_slice %0 {offsets = [0, 6], sizes = [8, 352], strides = [1, 1]} : vector<8x384xf32> to vector<8x352xf32>
    %21 = tpu.concatenate %14, %15, %16, %17, %18, %19, %20 in 0 : vector<8x352xf32>, vector<8x352xf32>, vector<8x352xf32>, vector<8x352xf32>, vector<8x352xf32>, vector<8x352xf32>, vector<8x352xf32> -> vector<56x352xf32>
    %cst_6 = arith.constant dense<0.000000e+00> : vector<8x352xf32>
    %22 = tpu.matmul %13, %21, %cst_6 {dimension_numbers = #tpu.dot_dimension_numbers<[1], [0], [0], [1], [0, 0, 1, 1], [], []>} : vector<8x56xf32>, vector<56x352xf32>, vector<8x352xf32> -> vector<8x352xf32>
    %c0_7 = arith.constant 0 : index
    %c0_8 = arith.constant 0 : index
    %c0_9 = arith.constant 0 : index
    %23 = vector.load %arg3[%c0_7, %c0_8, %c0_9] : memref<2x8x64xf32, #tpu.memory_space<vmem>>, vector<1x8x64xf32>
    %24 = vector.shape_cast %23 : vector<1x8x64xf32> to vector<8x64xf32>
    %25 = vector.extract_strided_slice %11 {offsets = [0, 0], sizes = [8, 256], strides = [1, 1]} : vector<8x262xf32> to vector<8x256xf32>
    %26 = vector.extract_strided_slice %11 {offsets = [0, 1], sizes = [8, 256], strides = [1, 1]} : vector<8x262xf32> to vector<8x256xf32>
    %27 = vector.extract_strided_slice %11 {offsets = [0, 2], sizes = [8, 256], strides = [1, 1]} : vector<8x262xf32> to vector<8x256xf32>
    %28 = vector.extract_strided_slice %11 {offsets = [0, 3], sizes = [8, 256], strides = [1, 1]} : vector<8x262xf32> to vector<8x256xf32>
    %29 = vector.extract_strided_slice %11 {offsets = [0, 4], sizes = [8, 256], strides = [1, 1]} : vector<8x262xf32> to vector<8x256xf32>
    %30 = vector.extract_strided_slice %11 {offsets = [0, 5], sizes = [8, 256], strides = [1, 1]} : vector<8x262xf32> to vector<8x256xf32>
    %31 = vector.extract_strided_slice %11 {offsets = [0, 6], sizes = [8, 256], strides = [1, 1]} : vector<8x262xf32> to vector<8x256xf32>
    %cst_10 = arith.constant 1.000000e+00 : f32
    %32 = vector.broadcast %cst_10 : f32 to vector<8x256xf32>
    %33 = tpu.concatenate %25, %26, %27, %28, %29, %30, %31, %32 in 0 : vector<8x256xf32>, vector<8x256xf32>, vector<8x256xf32>, vector<8x256xf32>, vector<8x256xf32>, vector<8x256xf32>, vector<8x256xf32>, vector<8x256xf32> -> vector<64x256xf32>
    %cst_11 = arith.constant dense<0.000000e+00> : vector<8x256xf32>
    %34 = tpu.matmul %24, %33, %cst_11 {dimension_numbers = #tpu.dot_dimension_numbers<[1], [0], [0], [1], [0, 0, 1, 1], [], []>} : vector<8x64xf32>, vector<64x256xf32>, vector<8x256xf32> -> vector<8x256xf32>
    %c1_12 = arith.constant 1 : index
    %c0_13 = arith.constant 0 : index
    %c0_14 = arith.constant 0 : index
    %35 = vector.load %arg3[%c1_12, %c0_13, %c0_14] : memref<2x8x64xf32, #tpu.memory_space<vmem>>, vector<1x8x64xf32>
    %36 = vector.shape_cast %35 : vector<1x8x64xf32> to vector<8x64xf32>
    %37 = vector.extract_strided_slice %22 {offsets = [0, 0], sizes = [8, 256], strides = [1, 1]} : vector<8x352xf32> to vector<8x256xf32>
    %38 = vector.extract_strided_slice %22 {offsets = [0, 16], sizes = [8, 256], strides = [1, 1]} : vector<8x352xf32> to vector<8x256xf32>
    %39 = vector.extract_strided_slice %22 {offsets = [0, 32], sizes = [8, 256], strides = [1, 1]} : vector<8x352xf32> to vector<8x256xf32>
    %40 = vector.extract_strided_slice %22 {offsets = [0, 48], sizes = [8, 256], strides = [1, 1]} : vector<8x352xf32> to vector<8x256xf32>
    %41 = vector.extract_strided_slice %22 {offsets = [0, 64], sizes = [8, 256], strides = [1, 1]} : vector<8x352xf32> to vector<8x256xf32>
    %42 = vector.extract_strided_slice %22 {offsets = [0, 80], sizes = [8, 256], strides = [1, 1]} : vector<8x352xf32> to vector<8x256xf32>
    %43 = vector.extract_strided_slice %22 {offsets = [0, 96], sizes = [8, 256], strides = [1, 1]} : vector<8x352xf32> to vector<8x256xf32>
    %cst_15 = arith.constant 1.000000e+00 : f32
    %44 = vector.broadcast %cst_15 : f32 to vector<8x256xf32>
    %45 = tpu.concatenate %37, %38, %39, %40, %41, %42, %43, %44 in 0 : vector<8x256xf32>, vector<8x256xf32>, vector<8x256xf32>, vector<8x256xf32>, vector<8x256xf32>, vector<8x256xf32>, vector<8x256xf32>, vector<8x256xf32> -> vector<64x256xf32>
    %cst_16 = arith.constant dense<0.000000e+00> : vector<8x256xf32>
    %46 = tpu.matmul %36, %45, %cst_16 {dimension_numbers = #tpu.dot_dimension_numbers<[1], [0], [0], [1], [0, 0, 1, 1], [], []>} : vector<8x64xf32>, vector<64x256xf32>, vector<8x256xf32> -> vector<8x256xf32>
    %47 = arith.addf %34, %46 : vector<8x256xf32>
    %cst_17 = arith.constant 0.000000e+00 : f32
    %48 = vector.broadcast %cst_17 : f32 to vector<8x256xf32>
    %49 = arith.maximumf %47, %48 : vector<8x256xf32>
    %c0_18 = arith.constant 0 : index
    %c0_19 = arith.constant 0 : index
    %50 = vector.load %arg4[%c0_18, %c0_19] : memref<8x256xf32, #tpu.memory_space<vmem>>, vector<8x256xf32>
    tpu.vector_store %arg4[%c0_18, %c0_19], %49 {strides = array<i32>} : memref<8x256xf32, #tpu.memory_space<vmem>>, vector<8x256xf32>,
    return
  }
  func.func @transform_0(%arg0: i32) -> (i32, i32) {
    %c0_i32 = arith.constant 0 : i32
    %c0_i32_0 = arith.constant 0 : i32
    return %arg0, %c0_i32 : i32, i32
  }
  func.func @transform_1(%arg0: i32) -> (i32, i32, i32) {
    %c0_i32 = arith.constant 0 : i32
    %c0_i32_0 = arith.constant 0 : i32
    %c0_i32_1 = arith.constant 0 : i32
    %c0_i32_2 = arith.constant 0 : i32
    return %c0_i32, %c0_i32_0, %c0_i32_1 : i32, i32, i32
  }
  func.func @transform_2(%arg0: i32) -> (i32, i32, i32) {
    %c0_i32 = arith.constant 0 : i32
    %c0_i32_0 = arith.constant 0 : i32
    %c0_i32_1 = arith.constant 0 : i32
    %c0_i32_2 = arith.constant 0 : i32
    return %c0_i32, %c0_i32_0, %c0_i32_1 : i32, i32, i32
  }
  func.func @transform_3(%arg0: i32) -> (i32, i32) {
    %c0_i32 = arith.constant 0 : i32
    %c0_i32_0 = arith.constant 0 : i32
    return %arg0, %c0_i32 : i32, i32
  }
}

</mosaic_0001>

<bundles_post_ra>
// kernel: tile.18
= control target key start
LH: loop header
LB: loop body
LE: loop exit
PB: predicated region body
PF: predicated region fallthrough
CT: control target
= control target key end

     0   :  { %s22_s0 = inlined_call_operand.vmem [shape: f32[4], index: 0, kind: input, shape index: {}]   ;;  %s23_s1 = inlined_call_operand.vmem [shape: f32[2,4], index: 1, kind: output, shape index: {}]  }
   0x1   :  { %v4_v0 = vld [vmem:[%s22_s0] ss:$0 sm:$0xff] }
   0x2   :  { %5 = vst [vmem:[%s23_s1] sm:$0x3] %v4_v0 }

// kernel: tile.1
= control target key start
LH: loop header
LB: loop body
LE: loop exit
PB: predicated region body
PF: predicated region fallthrough
CT: control target
= control target key end

     0   :  { %s34_s8 = smov 125   ;;  %vm7_vm0 = vcmask 7168   ;;  %s35_s11 = smov 126   ;;  %s61_s0 = inlined_call_operand.vmem [shape: f32[2,4], index: 0, kind: input, shape index: {}]   ;;  %s62_s1 = inlined_call_operand.vmem [shape: f32[8,1], index: 1, kind: output, shape index: {}]  }
   0x1   :  { %v4_v0 = vld [vmem:[%s61_s0] sm:$0x3]  ;;  %s33_s0 = smov 127  }
   0x2   :  { %5 = vst [vmem:[#allocation0] sm:$0x3] %v4_v0 }
   0x9   :  { %v9_v1 = vld [vmem:[#allocation0] sm:$0x3]  }
   0xa   :  { %v21_v2 = vld [vmem:[#allocation0] sm:$0x3]   ;;  %10 = vrot.lane.b32.xlu0 %v9_v1, %s33_s0 }
   0xb   :  { %22 = vrot.lane.b32.xlu1 %v21_v2, %s34_s8  ;;  %v6_v3 = vld [vmem:[#allocation0] sm:$0x3]  }
   0xc   :  { %v15_v4 = vld [vmem:[#allocation0] sm:$0x3]   ;;  %8 = vst.msk [vmem:[%s62_s1] ss:$4 sm:$0x3] %vm7_vm0, %v6_v3  }
   0xe   :  { %16 = vrot.lane.b32.xlu0 %v15_v4, %s35_s11 }
  0x7c   :  { %v11_v5 = vpop.permute.xlu0 %10  }
  0x7d   :  { %v23_v6 = vpop.permute.xlu1 %22   ;;  %27 = vst.msk [vmem:[%s62_s1 + $0x1] ss:$4 sm:$0x3] %vm7_vm0, %v11_v5  }
  0x7e   :  { %29 = vst.msk [vmem:[%s62_s1 + $0x3] ss:$4 sm:$0x3] %vm7_vm0, %v23_v6  }
  0x80   :  { %v17_v7 = vpop.permute.xlu0 %16  }
  0x81   :  { %28 = vst.msk [vmem:[%s62_s1 + $0x2] ss:$4 sm:$0x3] %vm7_vm0, %v17_v7  }

// kernel: gcn_forward.1
= control target key start
LH: loop header
LB: loop body
LE: loop exit
PB: predicated region body
PF: predicated region fallthrough
CT: control target
= control target key end

     0   :  { %v1001_v2 = vmov 0.0|0.0   ;;  %s1002_s16 = smov 96   ;;  %s1003_s17 = smov 112   ;;  %v1005_v5 = vmov 0.0   ;;  %vm1008_vm0 = vmmov 0   ;;  %vm27_vm1 = vcmask 916480   ;;  %s1227_s0 = inlined_call_operand.vmem [shape: f32[8,384], index: 0, kind: input, shape index: {}]   ;;  %s1228_s1 = inlined_call_operand.vmem [shape: f32[2,8,56], index: 1, kind: input, shape index: {}]   ;;  %s1229_s2 = inlined_call_operand.vmem [shape: f32[2,8,64], index: 2, kind: input, shape index: {}]   ;;  %s1230_s3 = inlined_call_operand.vmem [shape: f32[8,256], index: 3, kind: output, shape index: {}]  }
   0x1   :  { %v1040_v0 = vld [vmem:[%s1227_s0 + $0x8] sm:$0xff]  ;;  %v1045_v1 = vld [vmem:[%s1227_s0 + $0x10] sm:$0xff]  ;;  %811 = vmatprep.subr.bf16.mxu1 %v1001_v2  ;;  %v1055_v4 = vld [vmem:[%s1227_s0] sm:$0xff]  ;;  %s1004_s20 = smov 80   ;;  %161 = vmatprep.mubr.f32.mxu0 %v1005_v5  ;;  %s1006_s21 = smov 48   ;;  %vm51_vm2 = vcmask 654336  }
   0x2   :  { %v896_v3 = vpack.i.bf16 %v1045_v1, %v1040_v0  ;;  %s1007_s0 = smov 64   ;;  %779 = vmatprep.mubr.msk.f32.mxu1 %vm1008_vm0, %v1005_v5  ;;  %s1009_s22 = smov 32   ;;  %vm39_vm3 = vcmask 785408   ;;  %vm75_vm4 = vcmask 392192   ;;  %vm63_vm5 = vcmask 523264   ;;  %v17_v48 = vld [vmem:[%s1228_s1] sm:$0xff] }
   0x3   :  { %s1010_s23 = smov 127   ;;  %s1011_s24 = smov 126   ;;  %vm87_vm6 = vcmask 261120   ;;  %vm93_vm7 = vcmask 457728   ;;  %vm246_vm8 = vcmask 1039360   ;;  %vm258_vm9 = vcmask 1031168  }
   0x4   :  { %897 = vrot.lane.b32.xlu1 %v896_v3, %s1002_s16  ;;  %892 = vrot.lane.b32.xlu0 %v896_v3, %s1003_s17  ;;  %s1012_s25 = smov 125   ;;  %s1013_s26 = smov 124   ;;  %vm270_vm10 = vcmask 1022976   ;;  %vm282_vm11 = vcmask 1014784   ;;  %vm294_vm12 = vcmask 1006592   ;;  %vm306_vm13 = vcmask 998400  }
   0x5   :  { %s1014_s27 = smov 123   ;;  %s1015_s28 = smov 122  }
   0x8   :  { %902 = vrot.lane.b32.xlu1 %v896_v3, %s1004_s20  ;;  %21 = vrot.lane.b32.xlu0 %v1055_v4, %s1003_s17 }
   0xc   :  { %45 = vrot.lane.b32.xlu1 %v1055_v4, %s1004_s20  ;;  %33 = vrot.lane.b32.xlu0 %v1055_v4, %s1002_s16 }
  0x10   :  { %912 = vrot.lane.b32.xlu1 %v896_v3, %s1006_s21  ;;  %907 = vrot.lane.b32.xlu0 %v896_v3, %s1007_s0 }
  0x14   :  { %69 = vrot.lane.b32.xlu1 %v1055_v4, %s1006_s21  ;;  %57 = vrot.lane.b32.xlu0 %v1055_v4, %s1007_s0 }
  0x18   :  { %85 = vrot.lane.b32.xlu1 %v1045_v1, %s1009_s22  ;;  %83 = vrot.lane.b32.xlu0 %v1040_v0, %s1009_s22 }
  0x1c   :  { %81 = vrot.lane.b32.xlu1 %v1055_v4, %s1009_s22  ;;  %917 = vrot.lane.b32.xlu0 %v896_v3, %s1010_s23 }
  0x20   :  { %922 = vrot.lane.b32.xlu1 %v896_v3, %s1011_s24  ;;  %240 = vrot.lane.b32.xlu0 %v1055_v4, %s1010_s23 }
  0x24   :  { %252 = vrot.lane.b32.xlu1 %v1055_v4, %s1011_s24  ;;  %927 = vrot.lane.b32.xlu0 %v896_v3, %s1012_s25 }
  0x28   :  { %932 = vrot.lane.b32.xlu1 %v896_v3, %s1013_s26  ;;  %264 = vrot.lane.b32.xlu0 %v1055_v4, %s1012_s25 }
  0x2c   :  { %276 = vrot.lane.b32.xlu1 %v1055_v4, %s1013_s26  ;;  %937 = vrot.lane.b32.xlu0 %v896_v3, %s1014_s27 }
  0x30   :  { %302 = vrot.lane.b32.xlu1 %v1040_v0, %s1015_s28  ;;  %288 = vrot.lane.b32.xlu0 %v1055_v4, %s1014_s27 }
  0x34   :  { %300 = vrot.lane.b32.xlu1 %v1055_v4, %s1015_s28  ;;  %304 = vrot.lane.b32.xlu0 %v1045_v1, %s1015_s28 }
  0x76   :  { %v898_v6 = vpop.permute.xlu1 %897  ;;  %v893_v7 = vpop.permute.xlu0 %892 }
  0x77   :  { %v895_v8 = vunpack.i.h.bf16 %v893_v7  ;;  %v894_v9 = vunpack.i.l.bf16 %v893_v7  ;;  %v900_v10 = vunpack.i.h.bf16 %v898_v6  ;;  %v899_v11 = vunpack.i.l.bf16 %v898_v6 }
  0x79   :  { %v812_v12 = vpack.c.bf16 %v895_v8, %v1045_v1  ;;  %v29_v13 = vsel %vm27_vm1, %v894_v9, %v895_v8  ;;  %v41_v22 = vsel %vm39_vm3, %v899_v11, %v900_v10 }
  0x7a   :  { %v903_v14 = vpop.permute.xlu1 %902  ;;  %v22_v15 = vpop.permute.xlu0 %21  ;;  %v799_v16 = vpack.c.bf16 %v29_v13, %v1040_v0 }
  0x7b   :  { %v905_v17 = vunpack.i.h.bf16 %v903_v14  ;;  %v904_v18 = vunpack.i.l.bf16 %v903_v14  ;;  %v28_v19 = vsel %vm27_vm1, %v22_v15, %v894_v9  ;;  %813 = vmatpush3.bf16.msra.mxu1 %v812_v12 }
  0x7c   :  { %800 = vmatprep.subr.bf16.mxu0 %v799_v16  ;;  %814 = vmatprep.subr.bf16.mxu1 %v1001_v2  ;;  %v801_v20 = vpack.c.bf16 %v28_v19, %v1055_v4 }
  0x7d   :  { %v815_v21 = vpack.c.bf16 %v905_v17, %v900_v10  ;;  %v53_v23 = vsel %vm51_vm2, %v904_v18, %v905_v17 }
  0x7e   :  { %v46_v24 = vpop.permute.xlu1 %45  ;;  %802 = vmatpush1.bf16.msra.mxu0 %v801_v20  ;;  %v34_v25 = vpop.permute.xlu0 %33  ;;  %v803_v26 = vpack.c.bf16 %v53_v23, %v41_v22 }
  0x7f   :  { %v52_v27 = vsel %vm51_vm2, %v46_v24, %v904_v18  ;;  %v40_v28 = vsel %vm39_vm3, %v34_v25, %v899_v11  ;;  %816 = vmatpush3.bf16.msra.mxu1 %v815_v21 }
  0x80   :  { %v805_v29 = vpack.c.bf16 %v52_v27, %v40_v28  ;;  %804 = vmatprep.subr.bf16.mxu0 %v803_v26  ;;  %817 = vmatprep.subr.bf16.mxu1 %v1001_v2  ;;  %v743_v28 = vld [vmem:[%s1228_s1 + $0x8] sm:$0xff] }
  0x82   :  { %v913_v30 = vpop.permute.xlu1 %912  ;;  %806 = vmatpush1.bf16.msra.mxu0 %v805_v29  ;;  %v908_v31 = vpop.permute.xlu0 %907 }
  0x83   :  { %v915_v32 = vunpack.i.h.bf16 %v913_v30  ;;  %v914_v33 = vunpack.i.l.bf16 %v913_v30  ;;  %v910_v34 = vunpack.i.h.bf16 %v908_v31  ;;  %v909_v35 = vunpack.i.l.bf16 %v908_v31 }
  0x85   :  { %v818_v36 = vpack.c.bf16 %v915_v32, %v910_v34  ;;  %v65_v37 = vsel %vm63_vm5, %v909_v35, %v910_v34  ;;  %v77_v38 = vsel %vm75_vm4, %v914_v33, %v915_v32 }
  0x86   :  { %v70_v39 = vpop.permute.xlu1 %69  ;;  %v58_v40 = vpop.permute.xlu0 %57  ;;  %v807_v41 = vpack.c.bf16 %v77_v38, %v65_v37 }
  0x87   :  { %v76_v42 = vsel %vm75_vm4, %v70_v39, %v914_v33  ;;  %v64_v43 = vsel %vm63_vm5, %v58_v40, %v909_v35  ;;  %819 = vmatpush3.bf16.msra.mxu1 %v818_v36 }
  0x88   :  { %v809_v44 = vpack.c.bf16 %v76_v42, %v64_v43  ;;  %808 = vmatprep.subr.bf16.mxu0 %v807_v41  ;;  %777 = vmatprep.subr.mxu1 %v1005_v5 }
  0x8a   :  { %v86_v45 = vpop.permute.xlu1 %85  ;;  %v84_v46 = vpop.permute.xlu0 %83  ;;  %810 = vmatpush1.bf16.msra.mxu0 %v809_v44 }
  0x8b   :  { %v89_v47 = vsel %vm87_vm6, %v84_v46, %v86_v45  ;;  %778 = vmatpush3.msra.mxu1 %v86_v45 }
  0x8c   :  { %109 = vmatprep.subr.mxu0 %v89_v47  ;;  %832 = vmatprep.subr.bf16.mxu1 %v1001_v2 }
  0x8d   :  { %780 = vmatmul.mubr.msk.f32.vlgmr.msra.gmra.mrb[0].mxu1 %vm93_vm7, %v17_v48 }
  0x8e   :  { %v82_v49 = vpop.permute.xlu1 %81  ;;  %v918_v50 = vpop.permute.xlu0 %917  ;;  %796 = vmatprep.mubr.msk.f32.mxu1 %vm1008_vm0, %v1005_v5 }
  0x8f   :  { %v920_v51 = vunpack.i.h.bf16 %v918_v50  ;;  %v919_v52 = vunpack.i.l.bf16 %v918_v50  ;;  %v88_v53 = vsel %vm87_vm6, %v82_v49, %v84_v46 }
  0x90   :  { %110 = vmatpush1.msra.mxu0 %v88_v53 }
  0x91   :  { %v833_v54 = vpack.c.bf16 %v920_v51, %v1045_v1  ;;  %741 = vmatmul.mubr.msk.f32.vlgmr.msra.gmra.mrb[0].mxu0 %vm93_vm7, %v17_v48  ;;  %v248_v55 = vsel %vm246_vm8, %v919_v52, %v920_v51 }
  0x92   :  { %v923_v56 = vpop.permute.xlu1 %922  ;;  %v241_v57 = vpop.permute.xlu0 %240  ;;  %v820_v58 = vpack.c.bf16 %v248_v55, %v1040_v0  ;;  %379 = vmatprep.mubr.f32.mxu0 %v1005_v5 }
  0x93   :  { %v247_v59 = vsel %vm246_vm8, %v241_v57, %v919_v52  ;;  %834 = vmatpush3.bf16.msra.mxu1 %v833_v54  ;;  %v925_v61 = vunpack.i.h.bf16 %v923_v56  ;;  %v924_v62 = vunpack.i.l.bf16 %v923_v56 }
  0x94   :  { %v822_v60 = vpack.c.bf16 %v247_v59, %v1055_v4  ;;  %821 = vmatprep.subr.bf16.mxu0 %v820_v58  ;;  %835 = vmatprep.subr.bf16.mxu1 %v1001_v2 }
  0x95   :  { %v260_v7 = vsel %vm258_vm9, %v924_v62, %v925_v61 }
  0x96   :  { %v253_v63 = vpop.permute.xlu1 %252  ;;  %v928_v1 = vpop.permute.xlu0 %927  ;;  %823 = vmatpush1.bf16.msra.mxu0 %v822_v60 }
  0x97   :  { %v930_v3 = vunpack.i.h.bf16 %v928_v1  ;;  %v929_v6 = vunpack.i.l.bf16 %v928_v1  ;;  %v259_v11 = vsel %vm258_vm9, %v253_v63, %v924_v62 }
  0x99   :  { %v836_v0 = vpack.c.bf16 %v930_v3, %v925_v61  ;;  %v272_v8 = vsel %vm270_vm10, %v929_v6, %v930_v3 }
  0x9a   :  { %v933_v9 = vpop.permute.xlu1 %932  ;;  %v265_v10 = vpop.permute.xlu0 %264  ;;  %v824_v4 = vpack.c.bf16 %v272_v8, %v260_v7 }
  0x9b   :  { %v271_v12 = vsel %vm270_vm10, %v265_v10, %v929_v6  ;;  %837 = vmatpush3.bf16.msra.mxu1 %v836_v0  ;;  %v935_v14 = vunpack.i.h.bf16 %v933_v9  ;;  %v934_v15 = vunpack.i.l.bf16 %v933_v9 }
  0x9c   :  { %v826_v13 = vpack.c.bf16 %v271_v12, %v259_v11  ;;  %825 = vmatprep.subr.bf16.mxu0 %v824_v4  ;;  %838 = vmatprep.subr.bf16.mxu1 %v1001_v2 }
  0x9d   :  { %v284_v21 = vsel %vm282_vm11, %v934_v15, %v935_v14 }
  0x9e   :  { %v277_v16 = vpop.permute.xlu1 %276  ;;  %v938_v17 = vpop.permute.xlu0 %937  ;;  %827 = vmatpush1.bf16.msra.mxu0 %v826_v13 }
  0x9f   :  { %v940_v18 = vunpack.i.h.bf16 %v938_v17  ;;  %v939_v19 = vunpack.i.l.bf16 %v938_v17  ;;  %v283_v26 = vsel %vm282_vm11, %v277_v16, %v934_v15 }
  0xa1   :  { %v839_v20 = vpack.c.bf16 %v940_v18, %v935_v14  ;;  %v296_v22 = vsel %vm294_vm12, %v939_v19, %v940_v18 }
  0xa2   :  { %v303_v23 = vpop.permute.xlu1 %302  ;;  %v289_v24 = vpop.permute.xlu0 %288  ;;  %v828_v25 = vpack.c.bf16 %v296_v22, %v284_v21 }
  0xa3   :  { %v295_v2 = vsel %vm294_vm12, %v289_v24, %v939_v19  ;;  %840 = vmatpush3.bf16.msra.mxu1 %v839_v20 }
  0xa4   :  { %v830_v27 = vpack.c.bf16 %v295_v2, %v283_v26  ;;  %829 = vmatprep.subr.bf16.mxu0 %v828_v25  ;;  %794 = vmatprep.subr.mxu1 %v1005_v5 }
  0xa6   :  { %v301_v29 = vpop.permute.xlu1 %300  ;;  %v305_v30 = vpop.permute.xlu0 %304  ;;  %831 = vmatpush1.bf16.msra.mxu0 %v830_v27 }
  0xa7   :  { %v308_v31 = vsel %vm306_vm13, %v303_v23, %v305_v30  ;;  %795 = vmatpush3.msra.mxu1 %v305_v30  ;;  %v307_v32 = vsel %vm306_vm13, %v301_v29, %v303_v23 }
  0xa8   :  { %327 = vmatprep.subr.mxu0 %v308_v31  ;;  %797 = vmatmul.mubr.msk.f32.vlgmr.msra.gmra.mrb[2].mxu1 %vm93_vm7, %v743_v28 }
  0xa9   :  { %652 = vmatprep.mubr.f32.mxu1 %v1005_v5 }
  0xaa   :  { %328 = vmatpush1.msra.mxu0 %v307_v32 }
  0xab   :  { %744 = vmatmul.mubr.msk.f32.vlgmr.msra.gmra.mrb[2].mxu0 %vm93_vm7, %v743_v28 }
  0xac   :  { %726 = vmatprep.mubr.f32.mxu0 %v1005_v5 }
 0x160   :  { %v234_v33 = vpop.f32.mrb[0].mxu1 }
 0x161   :  { %v781_v34 = vpop.f32.mrb[1].mxu1 }
 0x164   :  { %v163_v35 = vpop.f32.mrb[0].mxu0 }
 0x165   :  { %480 = vrot.lane.b32.xlu1 %v163_v35, %s1012_s25  ;;  %460 = vrot.lane.b32.xlu0 %v163_v35, %s1010_s23  ;;  %v165_v36 = vpop.f32.mrb[1].mxu0 }
 0x166   :  { %v951_v37 = vpack.i.bf16 %v234_v33, %v165_v36 }
 0x169   :  { %500 = vrot.lane.b32.xlu1 %v163_v35, %s1014_s27  ;;  %470 = vrot.lane.b32.xlu0 %v163_v35, %s1011_s24 }
 0x16d   :  { %490 = vrot.lane.b32.xlu0 %v163_v35, %s1013_s26  ;;  %952 = vrot.lane.b32.xlu1 %v951_v37, %s1012_s25 }
 0x171   :  { %962 = vrot.lane.b32.xlu1 %v951_v37, %s1014_s27  ;;  %942 = vrot.lane.b32.xlu0 %v951_v37, %s1010_s23 }
 0x175   :  { %947 = vrot.lane.b32.xlu0 %v951_v37, %s1011_s24 }
 0x179   :  { %957 = vrot.lane.b32.xlu0 %v951_v37, %s1013_s26 }
 0x17b   :  { %v452_v5 = vpop.f32.mrb[2].mxu1 }
 0x17c   :  { %v798_v38 = vpop.f32.mrb[3].mxu1 }
 0x17e   :  { %v1162_v39 = vpop.f32.mrb[2].mxu0 }
 0x17f   :  { %535 = vrot.lane.b32.xlu0 %v1162_v39, %s1002_s16  ;;  %525 = vrot.lane.b32.xlu1 %v1162_v39, %s1003_s17  ;;  %v1168_v40 = vpop.f32.mrb[3].mxu0 }
 0x180   :  { %v971_v41 = vpack.i.bf16 %v452_v5, %v1168_v40 }
 0x183   :  { %555 = vrot.lane.b32.xlu0 %v1162_v39, %s1007_s0  ;;  %545 = vrot.lane.b32.xlu1 %v1162_v39, %s1004_s20 }
 0x187   :  { %565 = vrot.lane.b32.xlu1 %v1162_v39, %s1006_s21  ;;  %972 = vrot.lane.b32.xlu0 %v971_v41, %s1002_s16 }
 0x18b   :  { %982 = vrot.lane.b32.xlu0 %v971_v41, %s1007_s0  ;;  %967 = vrot.lane.b32.xlu1 %v971_v41, %s1003_s17 }
 0x18f   :  { %987 = vrot.lane.b32.xlu0 %v951_v37, %s1015_s28  ;;  %977 = vrot.lane.b32.xlu1 %v971_v41, %s1004_s20 }
 0x193   :  { %510 = vrot.lane.b32.xlu0 %v163_v35, %s1015_s28  ;;  %992 = vrot.lane.b32.xlu1 %v971_v41, %s1006_s21 }
 0x197   :  { %997 = vrot.lane.b32.xlu1 %v971_v41, %s1009_s22 }
 0x19b   :  { %575 = vrot.lane.b32.xlu1 %v1162_v39, %s1009_s22 }
 0x1d7   :  { %v481_v42 = vpop.permute.xlu1 %480  ;;  %v461_v43 = vpop.permute.xlu0 %460 }
 0x1db   :  { %v501_v44 = vpop.permute.xlu1 %500  ;;  %v471_v45 = vpop.permute.xlu0 %470 }
 0x1df   :  { %v491_v46 = vpop.permute.xlu0 %490  ;;  %v953_v47 = vpop.permute.xlu1 %952 }
 0x1e0   :  { %v955_v51 = vunpack.i.h.bf16 %v953_v47  ;;  %v954_v52 = vunpack.i.l.bf16 %v953_v47  ;;  %v1016_v47 = vmov 1.0  }
 0x1e2   :  { %v486_v61 = vsel %vm270_vm10, %v481_v42, %v954_v52  ;;  %v487_v62 = vsel %vm270_vm10, %v954_v52, %v955_v51 }
 0x1e3   :  { %v943_v48 = vpop.permute.xlu0 %942  ;;  %v963_v55 = vpop.permute.xlu1 %962 }
 0x1e4   :  { %v945_v49 = vunpack.i.h.bf16 %v943_v48  ;;  %v944_v50 = vunpack.i.l.bf16 %v943_v48  ;;  %v965_v63 = vunpack.i.h.bf16 %v963_v55  ;;  %v964_v1 = vunpack.i.l.bf16 %v963_v55 }
 0x1e6   :  { %v466_v53 = vsel %vm246_vm8, %v461_v43, %v944_v50  ;;  %v467_v54 = vsel %vm246_vm8, %v944_v50, %v945_v49  ;;  %v506_v4 = vsel %vm294_vm12, %v501_v44, %v964_v1  ;;  %v507_v13 = vsel %vm294_vm12, %v964_v1, %v965_v63 }
 0x1e7   :  { %v859_v56 = vpack.c.bf16 %v466_v53, %v163_v35  ;;  %v948_v57 = vpop.permute.xlu0 %947  ;;  %v857_v58 = vpack.c.bf16 %v467_v54, %v165_v36 }
 0x1e8   :  { %v950_v59 = vunpack.i.h.bf16 %v948_v57  ;;  %v949_v60 = vunpack.i.l.bf16 %v948_v57 }
 0x1e9   :  { %858 = vmatprep.subr.bf16.mxu0 %v857_v58 }
 0x1ea   :  { %v476_v3 = vsel %vm258_vm9, %v471_v45, %v949_v60  ;;  %860 = vmatpush1.bf16.msra.mxu0 %v859_v56  ;;  %v477_v6 = vsel %vm258_vm9, %v949_v60, %v950_v59  ;;  %v456_v60 = vld [vmem:[%s1229_s2] sm:$0xff] }
 0x1eb   :  { %v863_v0 = vpack.c.bf16 %v486_v61, %v476_v3  ;;  %v958_v7 = vpop.permute.xlu0 %957  ;;  %v861_v8 = vpack.c.bf16 %v487_v62, %v477_v6 }
 0x1ec   :  { %v960_v9 = vunpack.i.h.bf16 %v958_v7  ;;  %v959_v10 = vunpack.i.l.bf16 %v958_v7  ;;  %v746_v7 = vld [vmem:[%s1229_s2 + $0x8] sm:$0xff] }
 0x1ed   :  { %862 = vmatprep.subr.bf16.mxu0 %v861_v8 }
 0x1ee   :  { %v496_v11 = vsel %vm282_vm11, %v491_v46, %v959_v10  ;;  %864 = vmatpush1.bf16.msra.mxu0 %v863_v0  ;;  %v497_v12 = vsel %vm282_vm11, %v959_v10, %v960_v9 }
 0x1ef   :  { %v867_v14 = vpack.c.bf16 %v506_v4, %v496_v11  ;;  %v865_v15 = vpack.c.bf16 %v507_v13, %v497_v12 }
 0x1f1   :  { %866 = vmatprep.subr.bf16.mxu0 %v865_v15  ;;  %v536_v16 = vpop.permute.xlu0 %535  ;;  %v526_v17 = vpop.permute.xlu1 %525 }
 0x1f2   :  { %868 = vmatpush1.bf16.msra.mxu0 %v867_v14 }
 0x1f5   :  { %v556_v18 = vpop.permute.xlu0 %555  ;;  %v546_v19 = vpop.permute.xlu1 %545 }
 0x1f9   :  { %v566_v20 = vpop.permute.xlu1 %565  ;;  %v973_v21 = vpop.permute.xlu0 %972 }
 0x1fa   :  { %v975_v26 = vunpack.i.h.bf16 %v973_v21  ;;  %v974_v2 = vunpack.i.l.bf16 %v973_v21 }
 0x1fc   :  { %v541_v37 = vsel %vm39_vm3, %v536_v16, %v974_v2  ;;  %v542_v38 = vsel %vm39_vm3, %v974_v2, %v975_v26 }
 0x1fd   :  { %v983_v22 = vpop.permute.xlu0 %982  ;;  %v968_v23 = vpop.permute.xlu1 %967 }
 0x1fe   :  { %v970_v24 = vunpack.i.h.bf16 %v968_v23  ;;  %v969_v25 = vunpack.i.l.bf16 %v968_v23  ;;  %v985_v5 = vunpack.i.h.bf16 %v983_v22  ;;  %v984_v41 = vunpack.i.l.bf16 %v983_v22 }
 0x200   :  { %v531_v27 = vsel %vm27_vm1, %v526_v17, %v969_v25  ;;  %v532_v28 = vsel %vm27_vm1, %v969_v25, %v970_v24  ;;  %v561_v53 = vsel %vm63_vm5, %v556_v18, %v984_v41  ;;  %v562_v55 = vsel %vm63_vm5, %v984_v41, %v985_v5 }
 0x201   :  { %v843_v29 = vpack.c.bf16 %v531_v27, %v1162_v39  ;;  %v988_v30 = vpop.permute.xlu0 %987  ;;  %v978_v31 = vpop.permute.xlu1 %977  ;;  %v841_v32 = vpack.c.bf16 %v532_v28, %v1168_v40 }
 0x202   :  { %v990_v33 = vunpack.i.h.bf16 %v988_v30  ;;  %v989_v34 = vunpack.i.l.bf16 %v988_v30  ;;  %v980_v35 = vunpack.i.h.bf16 %v978_v31  ;;  %v979_v36 = vunpack.i.l.bf16 %v978_v31 }
 0x203   :  { %842 = vmatprep.subr.bf16.mxu1 %v841_v32 }
 0x204   :  { %v551_v42 = vsel %vm51_vm2, %v546_v19, %v979_v36  ;;  %844 = vmatpush1.bf16.msra.mxu1 %v843_v29  ;;  %v552_v39 = vsel %vm51_vm2, %v979_v36, %v980_v35  ;;  %v517_v43 = vsel %vm306_vm13, %v989_v34, %v990_v33 }
 0x205   :  { %v847_v44 = vpack.c.bf16 %v551_v42, %v541_v37  ;;  %v511_v40 = vpop.permute.xlu0 %510  ;;  %v993_v45 = vpop.permute.xlu1 %992  ;;  %v845_v46 = vpack.c.bf16 %v552_v39, %v542_v38  ;;  %v869_v48 = vpack.c.bf16 %v1016_v47, %v517_v43 }
 0x206   :  { %v516_v49 = vsel %vm306_vm13, %v511_v40, %v989_v34  ;;  %v995_v50 = vunpack.i.h.bf16 %v993_v45  ;;  %v994_v51 = vunpack.i.l.bf16 %v993_v45 }
 0x207   :  { %v871_v52 = vpack.c.bf16 %v1016_v47, %v516_v49  ;;  %846 = vmatprep.subr.bf16.mxu1 %v845_v46  ;;  %870 = vmatprep.subr.bf16.mxu0 %v869_v48 }
 0x208   :  { %v571_v54 = vsel %vm75_vm4, %v566_v20, %v994_v51  ;;  %848 = vmatpush1.bf16.msra.mxu1 %v847_v44  ;;  %v572_v56 = vsel %vm75_vm4, %v994_v51, %v995_v50 }
 0x209   :  { %v851_v57 = vpack.c.bf16 %v571_v54, %v561_v53  ;;  %872 = vmatpush1.bf16.msra.mxu0 %v871_v52  ;;  %v998_v58 = vpop.permute.xlu1 %997  ;;  %v849_v59 = vpack.c.bf16 %v572_v56, %v562_v55 }
 0x20a   :  { %v1000_v61 = vunpack.i.h.bf16 %v998_v58  ;;  %v999_v62 = vunpack.i.l.bf16 %v998_v58 }
 0x20b   :  { %850 = vmatprep.subr.bf16.mxu1 %v849_v59 }
 0x20c   :  { %852 = vmatpush1.bf16.msra.mxu1 %v851_v57  ;;  %v582_v63 = vsel %vm87_vm6, %v999_v62, %v1000_v61  ;;  %748 = vmatmul.mubr.msk.f32.vlgmr.msra.gmra.mrb[4].mxu0 %vm63_vm5, %v456_v60 }
 0x20d   :  { %v576_v1 = vpop.permute.xlu1 %575  ;;  %v853_v3 = vpack.c.bf16 %v1016_v47, %v582_v63 }
 0x20e   :  { %v581_v6 = vsel %vm87_vm6, %v576_v1, %v999_v62 }
 0x20f   :  { %v855_v0 = vpack.c.bf16 %v1016_v47, %v581_v6  ;;  %854 = vmatprep.subr.bf16.mxu1 %v853_v3 }
 0x211   :  { %856 = vmatpush1.bf16.msra.mxu1 %v855_v0 }
 0x214   :  { %747 = vmatmul.mubr.msk.f32.vlgmr.msra.gmra.mrb[4].mxu1 %vm63_vm5, %v746_v7 }
 0x2df   :  { %v728_v8 = vpop.f32.mrb[4].mxu0 }
 0x2e0   :  { %v730_v9 = vpop.f32.mrb[5].mxu0 }
 0x2e7   :  { %v654_v10 = vpop.f32.mrb[4].mxu1 }
 0x2e8   :  { %v729_v4 = vadd.f32 %v728_v8, %v654_v10  ;;  %v656_v11 = vpop.f32.mrb[5].mxu1 }
 0x2e9   :  { %v731_v12 = vadd.f32 %v730_v9, %v656_v11 }
 0x2ea   :  { %v733_v13 = vmax.f32 %v729_v4, 0.0 }
 0x2eb   :  { %v734_v14 = vmax.f32 %v731_v12, 0.0 }
 0x2ec   :  { %735 = vst [vmem:[%s1230_s3] sm:$0xff] %v733_v13 }
 0x2ed   :  { %736 = vst [vmem:[%s1230_s3 + $0x8] sm:$0xff] %v734_v14 }

</bundles_post_ra>
